<compile_context>
chip_gen: v7x
topology: tpu7x:2x2x1
jax: 0.10.0
libtpu: 0.0.40
codegen_flags: <defaults>
</compile_context>

<pallas_src>
import functools

import jax
import jax.numpy as jnp
from jax.experimental import pallas as pl
from jax.experimental.pallas import tpu as pltpu

EPS = 1e-5
NEG_SLOPE = 0.1
MATMUL_DTYPE = jnp.bfloat16   # MXU-native on v5e/v6e/v7x; f32 accumulation kept
ACT_DTYPE = jnp.bfloat16      # inter-layer activations in HBM


def _round_up(x, m):
    return (x + m - 1) // m * m


def _itemsize(dt):
    return jnp.dtype(dt).itemsize


def _vmem_limit(buffer_bytes):
    """Explicit scoped-VMEM budget: 2x the computed (already double-buffered)
    working set + headroom, floored at 32 MiB, capped at v7x's 64 MiB physical."""
    return int(min(max(2 * buffer_bytes + (4 << 20), 32 << 20), 64 << 20))


def _default_tile_b(batch, f_max):
    """Adaptive batch tile: aim for ~2 MiB bf16 activation blocks, capped so the
    layer working set stays comfortably inside v7x's 64 MiB VMEM."""
    b16 = _round_up(batch, 16)
    target_rows = (2 << 20) // max(_itemsize(ACT_DTYPE) * f_max, 1)
    tb = min(max(target_rows, 128), 2048, b16)
    return max(16, (tb // 16) * 16)


# ----------------------------------------------------------------------------
# Kernels
# ----------------------------------------------------------------------------
def _input_stats_kernel(x_ref, sum_ref, sumsq_ref):
    """Per-tile partial sum / sum-of-squares of x (padded batch rows are zero)."""
    x = x_ref[...].astype(jnp.float32)
    sum_ref[0] = jnp.sum(x, axis=0, keepdims=True)
    sumsq_ref[0] = jnp.sum(x * x, axis=0, keepdims=True)


def _make_layer_kernel(apply_act, need_mask, batch_true, tile_b):
    """t = act(scale*a + shift) @ W per batch tile + per-tile stats(t) partials."""

    def kernel(a_ref, scale_ref, shift_ref, w_ref, t_ref, sum_ref, sumsq_ref):
        h = a_ref[...].astype(jnp.float32) * scale_ref[...] + shift_ref[...]
        if apply_act:
            h = jnp.maximum(h, NEG_SLOPE * h)

        # Weights arrive already in MATMUL_DTYPE (pre-cast in the wrapper).
        t = jnp.dot(h.astype(MATMUL_DTYPE), w_ref[...],
                    preferred_element_type=jnp.float32)
        t_ref[...] = t.astype(t_ref.dtype)          # bf16 activation to HBM

        if need_mask:
            row = (pl.program_id(0) * tile_b
                   + jax.lax.broadcasted_iota(jnp.int32, t.shape, 0))
            t = jnp.where(row < batch_true, t, 0.0)
        # Stats from the f32 accumulator (before the bf16 cast above).
        sum_ref[0] = jnp.sum(t, axis=0, keepdims=True)
        sumsq_ref[0] = jnp.sum(t * t, axis=0, keepdims=True)

    return kernel


def _make_final_kernel(apply_act):
    """out = act(scale*a + shift) @ W_pad + b_pad  (lane-dense padded output)."""

    def kernel(a_ref, scale_ref, shift_ref, w_ref, b_ref, o_ref):
        h = a_ref[...].astype(jnp.float32) * scale_ref[...] + shift_ref[...]
        if apply_act:
            h = jnp.maximum(h, NEG_SLOPE * h)
        out = jnp.dot(h.astype(MATMUL_DTYPE), w_ref[...],
                      preferred_element_type=jnp.float32) + b_ref[...]
        o_ref[...] = out.astype(o_ref.dtype)

    return kernel


# ----------------------------------------------------------------------------
# pallas_call wrappers
# ----------------------------------------------------------------------------
def _input_stats(x_pad, tile_b):
    b_pad, f = x_pad.shape
    nt = b_pad // tile_b
    buf = 2 * tile_b * f * _itemsize(x_pad.dtype) + 2 * 2 * f * 4
    return pl.pallas_call(
        _input_stats_kernel,
        out_shape=(jax.ShapeDtypeStruct((nt, 1, f), jnp.float32),
                   jax.ShapeDtypeStruct((nt, 1, f), jnp.float32)),
        grid=(nt,),
        in_specs=[pl.BlockSpec((tile_b, f), lambda i: (i, 0))],
        out_specs=(pl.BlockSpec((1, 1, f), lambda i: (i, 0, 0)),
                   pl.BlockSpec((1, 1, f), lambda i: (i, 0, 0))),
        compiler_params=pltpu.CompilerParams(
            dimension_semantics=("parallel",),
            vmem_limit_bytes=_vmem_limit(buf)),
    )(x_pad)


def _layer(a, scale, shift, w, apply_act, tile_b, batch_true):
    b_pad, f_in = a.shape
    f_out = w.shape[1]
    nt = b_pad // tile_b
    need_mask = b_pad != batch_true
    kernel = _make_layer_kernel(apply_act, need_mask, batch_true, tile_b)

    ia, iw = _itemsize(ACT_DTYPE), _itemsize(MATMUL_DTYPE)
    buf = (2 * tile_b * f_in * ia          # a (double-buffered)
           + 2 * 2 * f_in * 4              # scale, shift rows
           + 2 * f_in * f_out * iw         # resident weight (dbl-buffered alloc)
           + 2 * tile_b * f_out * ia       # t output
           + 2 * 2 * f_out * 4)            # stats partials
    cost = pl.CostEstimate(
        flops=2 * b_pad * f_in * f_out + 8 * b_pad * (f_in + f_out),
        transcendentals=0,
        bytes_accessed=(b_pad * f_in * ia + f_in * f_out * iw
                        + b_pad * f_out * ia + 2 * f_in * 4
                        + 2 * nt * f_out * 4))
    t, s, ss = pl.pallas_call(
        kernel,
        out_shape=(jax.ShapeDtypeStruct((b_pad, f_out), ACT_DTYPE),
                   jax.ShapeDtypeStruct((nt, 1, f_out), jnp.float32),
                   jax.ShapeDtypeStruct((nt, 1, f_out), jnp.float32)),
        grid=(nt,),
        in_specs=[pl.BlockSpec((tile_b, f_in), lambda i: (i, 0)),
                  pl.BlockSpec((1, f_in), lambda i: (0, 0)),
                  pl.BlockSpec((1, f_in), lambda i: (0, 0)),
                  pl.BlockSpec((f_in, f_out), lambda i: (0, 0))],
        out_specs=(pl.BlockSpec((tile_b, f_out), lambda i: (i, 0)),
                   pl.BlockSpec((1, 1, f_out), lambda i: (i, 0, 0)),
                   pl.BlockSpec((1, 1, f_out), lambda i: (i, 0, 0))),
        compiler_params=pltpu.CompilerParams(
            dimension_semantics=("parallel",),
            vmem_limit_bytes=_vmem_limit(buf)),
        cost_estimate=cost,
    )(a, scale, shift, w)
    return t, s, ss


def _final(a, scale, shift, w_pad, b_row, apply_act, tile_b):
    b_pad, f_in = a.shape
    n_pad = w_pad.shape[1]
    nt = b_pad // tile_b

    ia, iw = _itemsize(ACT_DTYPE), _itemsize(MATMUL_DTYPE)
    buf = (2 * tile_b * f_in * ia + 2 * 2 * f_in * 4
           + 2 * f_in * n_pad * iw + 2 * n_pad * 4
           + 2 * tile_b * n_pad * 4)
    cost = pl.CostEstimate(
        flops=2 * b_pad * f_in * n_pad + 6 * b_pad * f_in,
        transcendentals=0,
        bytes_accessed=(b_pad * f_in * ia + f_in * n_pad * iw
                        + b_pad * n_pad * 4 + (2 * f_in + n_pad) * 4))
    return pl.pallas_call(
        _make_final_kernel(apply_act),
        out_shape=jax.ShapeDtypeStruct((b_pad, n_pad), jnp.float32),
        grid=(nt,),
        in_specs=[pl.BlockSpec((tile_b, f_in), lambda i: (i, 0)),
                  pl.BlockSpec((1, f_in), lambda i: (0, 0)),
                  pl.BlockSpec((1, f_in), lambda i: (0, 0)),
                  pl.BlockSpec((f_in, n_pad), lambda i: (0, 0)),
                  pl.BlockSpec((1, n_pad), lambda i: (0, 0))],
        out_specs=pl.BlockSpec((tile_b, n_pad), lambda i: (i, 0)),
        compiler_params=pltpu.CompilerParams(
            dimension_semantics=("parallel",),
            vmem_limit_bytes=_vmem_limit(buf)),
        cost_estimate=cost,
    )(a, scale, shift, w_pad, b_row)


def _scale_shift(s_part, ss_part, gamma, beta, n):
    """BN train-mode affine from per-tile partial sum / sum-of-squares."""
    s = jnp.sum(s_part, axis=0)        # (1, F)
    ss = jnp.sum(ss_part, axis=0)      # (1, F)
    mean = s / n
    var = jnp.maximum(ss / n - mean * mean, 0.0)
    scale = gamma * jax.lax.rsqrt(var + EPS)
    shift = beta - mean * scale
    return scale, shift


# ----------------------------------------------------------------------------
# Forward
# ----------------------------------------------------------------------------
@functools.partial(jax.jit, static_argnames=("tile_b",))
def mlp_forward(x, params, tile_b=None):
    """x: [batch, input_dim] float32.  params: see init_params."""
    b, f_in_true = x.shape
    blocks = params["blocks"]
    g0, bt0 = params["bn_in"]
    w_out, b_out = params["w_out"], params["b_out"]

    # Feature dims padded to multiples of 128 (lane-dense MXU / stores).
    dims_true = [f_in_true] + [w.shape[1] for (w, _, _) in blocks]
    dims_pad = [_round_up(d, 128) for d in dims_true]
    tgt_true = w_out.shape[1]
    tgt_pad = _round_up(tgt_true, 128)

    tb = tile_b if tile_b is not None else _default_tile_b(b, max(dims_pad))
    tb = max(16, (tb // 16) * 16)
    b_pad = _round_up(b, tb)

    # Pad batch rows (zeros) + input feature columns (zeros), cast to bf16 once.
    a = x.astype(jnp.float32)
    if b_pad != b or dims_pad[0] != f_in_true:
        a = jnp.pad(a, ((0, b_pad - b), (0, dims_pad[0] - f_in_true)))
    a = a.astype(ACT_DTYPE)

    def pad_row(r, f_pad, fill):
        r = r.astype(jnp.float32)
        if r.shape[1] == f_pad:
            return r
        return jnp.pad(r, ((0, 0), (0, f_pad - r.shape[1])), constant_values=fill)

    # Input BatchNorm1d(input_dim): batch stats of x (per-tile partials -> XLA reduce).
    s, ss = _input_stats(a, tb)
    scale, shift = _scale_shift(s, ss, pad_row(g0, dims_pad[0], 1.0),
                                pad_row(bt0, dims_pad[0], 0.0), b)

    # Hidden blocks: each kernel applies the *previous* BN (and activation,
    # except after the input BN which has none), does the matmul, and emits the
    # stats partials needed for its own BN.
    apply_act = False
    for li, (w, g, bt) in enumerate(blocks):
        f_ip, f_op = dims_pad[li], dims_pad[li + 1]
        wp = jnp.pad(w, ((0, f_ip - w.shape[0]),
                         (0, f_op - w.shape[1]))).astype(MATMUL_DTYPE)
        a, s, ss = _layer(a, scale, shift, wp, apply_act, tb, b)
        scale, shift = _scale_shift(s, ss, pad_row(g, f_op, 1.0),
                                    pad_row(bt, f_op, 0.0), b)
        apply_act = True

    # Final Linear(hidden[-1] -> target_dim) with bias, lane-dense padded N.
    f_lp = dims_pad[-1]
    w3 = jnp.pad(w_out, ((0, f_lp - w_out.shape[0]),
                         (0, tgt_pad - tgt_true))).astype(MATMUL_DTYPE)
    b3 = jnp.pad(b_out.astype(jnp.float32), ((0, 0), (0, tgt_pad - tgt_true)))
    out_pad = _final(a, scale, shift, w3, b3, apply_act, tb)
    return out_pad[:b, :tgt_true]


# ----------------------------------------------------------------------------
# Params / reference
# ----------------------------------------------------------------------------
def init_params(key, input_dim, hidden_size, target_dim=1):
    """PyTorch-default-style init.  Linear weights stored pre-transposed [in, out]."""
    dims = [input_dim] + list(hidden_size)
    keys = jax.random.split(key, len(hidden_size) + 2)

    def lin(k, fan_in, fan_out):
        bound = 1.0 / jnp.sqrt(fan_in)
        return jax.random.uniform(k, (fan_in, fan_out), jnp.float32, -bound, bound)

    blocks = []
    for i in range(len(hidden_size)):
        blocks.append((lin(keys[i], dims[i], dims[i + 1]),
                       jnp.ones((1, dims[i + 1]), jnp.float32),
                       jnp.zeros((1, dims[i + 1]), jnp.float32)))
    h_last = dims[-1]
    return {
        "bn_in": (jnp.ones((1, input_dim), jnp.float32),
                  jnp.zeros((1, input_dim), jnp.float32)),
        "blocks": blocks,
        "w_out": lin(keys[-2], h_last, target_dim),
        "b_out": jax.random.uniform(keys[-1], (1, target_dim), jnp.float32,
                                    -1.0 / jnp.sqrt(h_last), 1.0 / jnp.sqrt(h_last)),
    }


def mlp_reference(x, params):
    """Pure-JAX f32 reference mirroring the PyTorch forward (training-mode BN)."""
    def bn(h, g, b):
        m = jnp.mean(h, axis=0, keepdims=True)
        v = jnp.mean((h - m) ** 2, axis=0, keepdims=True)
        return (h - m) / jnp.sqrt(v + EPS) * g + b

    def lrelu(h):
        return jnp.where(h > 0, h, NEG_SLOPE * h)

    g0, bt0 = params["bn_in"]
    h = bn(x, g0, bt0)
    for (w, g, bt) in params["blocks"]:
        h = lrelu(bn(h @ w, g, bt))
    return h @ params["w_out"] + params["b_out"]


if __name__ == "__main__":
    batch, input_dim, hidden, target_dim = 20, 32, [64, 32], 1

    key = jax.random.PRNGKey(0)
    kx, kp = jax.random.split(key)
    x = jax.random.normal(kx, (batch, input_dim), jnp.float32)
    params = init_params(kp, input_dim, hidden, target_dim)

    # tile_b=16 -> 2 batch tiles with 12 padded rows: exercises the tiled /
    # masked-stats / feature-padding paths even at this small size.
    out = mlp_forward(x, params, tile_b=16)
    jax.block_until_ready(out)

    ref = mlp_reference(x, params)
    assert out.shape == (batch, target_dim), out.shape
    # bf16 matmuls + bf16 inter-layer activations vs. an f32 reference: expect
    # ~1e-2-level deviations after three BatchNorm stages -> loose tolerance.
    assert jnp.allclose(out, ref, atol=1e-1, rtol=1e-1), (out, ref)

    print("KERNEL_OK")
</pallas_src>

<mosaic_0001>
module attributes {stable_mosaic.version = 11 : i64} {
  func.func @_input_stats_kernel(%arg0: i32, %arg1: memref<16x128xbf16, #tpu.memory_space<vmem>>, %arg2: memref<1x1x128xf32, #tpu.memory_space<vmem>>, %arg3: memref<1x1x128xf32, #tpu.memory_space<vmem>>) attributes {dimension_semantics = [#tpu.dimension_semantics<parallel>], iteration_bounds = array<i64: 2>, scalar_prefetch = 0 : i64, scratch_operands = 0 : i64, tpu.core_type = #tpu.core_type<tc>, window_params = [{transform_indices = @transform_0, window_bounds = array<i64: 16, 128>}, {transform_indices = @transform_1, window_bounds = array<i64: 1, 1, 128>}, {transform_indices = @transform_2, window_bounds = array<i64: 1, 1, 128>}]} {
    %c0 = arith.constant 0 : index
    %c0_0 = arith.constant 0 : index
    %0 = vector.load %arg1[%c0, %c0_0] : memref<16x128xbf16, #tpu.memory_space<vmem>>, vector<16x128xbf16>
    %1 = arith.extf %0 : vector<16x128xbf16> to vector<16x128xf32>
    %cst = arith.constant dense<0.000000e+00> : vector<128xf32>
    %2 = vector.multi_reduction <add>, %1, %cst [0] : vector<16x128xf32> to vector<128xf32>
    %3 = vector.shape_cast %2 : vector<128xf32> to vector<1x128xf32>
    %c0_1 = arith.constant 0 : index
    %c0_2 = arith.constant 0 : index
    %c0_3 = arith.constant 0 : index
    %4 = vector.load %arg2[%c0_1, %c0_2, %c0_3] : memref<1x1x128xf32, #tpu.memory_space<vmem>>, vector<1x1x128xf32>
    %5 = vector.shape_cast %4 : vector<1x1x128xf32> to vector<1x128xf32>
    %6 = vector.shape_cast %3 : vector<1x128xf32> to vector<1x1x128xf32>
    tpu.vector_store %arg2[%c0_1, %c0_2, %c0_3], %6 {strides = array<i32>} : memref<1x1x128xf32, #tpu.memory_space<vmem>>, vector<1x1x128xf32>,
    %7 = arith.mulf %1, %1 : vector<16x128xf32>
    %cst_4 = arith.constant dense<0.000000e+00> : vector<128xf32>
    %8 = vector.multi_reduction <add>, %7, %cst_4 [0] : vector<16x128xf32> to vector<128xf32>
    %9 = vector.shape_cast %8 : vector<128xf32> to vector<1x128xf32>
    %c0_5 = arith.constant 0 : index
    %c0_6 = arith.constant 0 : index
    %c0_7 = arith.constant 0 : index
    %10 = vector.load %arg3[%c0_5, %c0_6, %c0_7] : memref<1x1x128xf32, #tpu.memory_space<vmem>>, vector<1x1x128xf32>
    %11 = vector.shape_cast %10 : vector<1x1x128xf32> to vector<1x128xf32>
    %12 = vector.shape_cast %9 : vector<1x128xf32> to vector<1x1x128xf32>
    tpu.vector_store %arg3[%c0_5, %c0_6, %c0_7], %12 {strides = array<i32>} : memref<1x1x128xf32, #tpu.memory_space<vmem>>, vector<1x1x128xf32>,
    return
  }
  func.func @transform_0(%arg0: i32) -> (i32, i32) {
    %c0_i32 = arith.constant 0 : i32
    %c0_i32_0 = arith.constant 0 : i32
    return %arg0, %c0_i32 : i32, i32
  }
  func.func @transform_1(%arg0: i32) -> (i32, i32, i32) {
    %c0_i32 = arith.constant 0 : i32
    %c0_i32_0 = arith.constant 0 : i32
    %c0_i32_1 = arith.constant 0 : i32
    return %arg0, %c0_i32, %c0_i32_0 : i32, i32, i32
  }
  func.func @transform_2(%arg0: i32) -> (i32, i32, i32) {
    %c0_i32 = arith.constant 0 : i32
    %c0_i32_0 = arith.constant 0 : i32
    %c0_i32_1 = arith.constant 0 : i32
    return %arg0, %c0_i32, %c0_i32_0 : i32, i32, i32
  }
}

module attributes {stable_mosaic.version = 11 : i64} {
  func.func @kernel(%arg0: i32, %arg1: memref<16x128xbf16, #tpu.memory_space<vmem>>, %arg2: memref<1x128xf32, #tpu.memory_space<vmem>>, %arg3: memref<1x128xf32, #tpu.memory_space<vmem>>, %arg4: memref<128x128xbf16, #tpu.memory_space<vmem>>, %arg5: memref<16x128xbf16, #tpu.memory_space<vmem>>, %arg6: memref<1x1x128xf32, #tpu.memory_space<vmem>>, %arg7: memref<1x1x128xf32, #tpu.memory_space<vmem>>) attributes {dimension_semantics = [#tpu.dimension_semantics<parallel>], iteration_bounds = array<i64: 2>, scalar_prefetch = 0 : i64, scratch_operands = 0 : i64, tpu.core_type = #tpu.core_type<tc>, window_params = [{transform_indices = @transform_0, window_bounds = array<i64: 16, 128>}, {pipeline_mode = #tpu.pipeline_mode<synchronous>, transform_indices = @transform_1, window_bounds = array<i64: 1, 128>}, {pipeline_mode = #tpu.pipeline_mode<synchronous>, transform_indices = @transform_2, window_bounds = array<i64: 1, 128>}, {pipeline_mode = #tpu.pipeline_mode<synchronous>, transform_indices = @transform_3, window_bounds = array<i64: 128, 128>}, {transform_indices = @transform_4, window_bounds = array<i64: 16, 128>}, {transform_indices = @transform_5, window_bounds = array<i64: 1, 1, 128>}, {transform_indices = @transform_6, window_bounds = array<i64: 1, 1, 128>}]} {
    %c0 = arith.constant 0 : index
    %c0_0 = arith.constant 0 : index
    %0 = vector.load %arg1[%c0, %c0_0] : memref<16x128xbf16, #tpu.memory_space<vmem>>, vector<16x128xbf16>
    %1 = arith.extf %0 : vector<16x128xbf16> to vector<16x128xf32>
    %c0_1 = arith.constant 0 : index
    %c0_2 = arith.constant 0 : index
    %2 = vector.load %arg2[%c0_1, %c0_2] : memref<1x128xf32, #tpu.memory_space<vmem>>, vector<1x128xf32>
    %3 = vector.broadcast %2 : vector<1x128xf32> to vector<16x128xf32>
    %4 = arith.mulf %1, %3 : vector<16x128xf32>
    %c0_3 = arith.constant 0 : index
    %c0_4 = arith.constant 0 : index
    %5 = vector.load %arg3[%c0_3, %c0_4] : memref<1x128xf32, #tpu.memory_space<vmem>>, vector<1x128xf32>
    %6 = vector.broadcast %5 : vector<1x128xf32> to vector<16x128xf32>
    %7 = arith.addf %4, %6 : vector<16x128xf32>
    %8 = arith.truncf %7 : vector<16x128xf32> to vector<16x128xbf16>
    %c0_5 = arith.constant 0 : index
    %c0_6 = arith.constant 0 : index
    %9 = vector.load %arg4[%c0_5, %c0_6] : memref<128x128xbf16, #tpu.memory_space<vmem>>, vector<128x128xbf16>
    %cst = arith.constant dense<0.000000e+00> : vector<16x128xf32>
    %10 = tpu.matmul %8, %9, %cst {dimension_numbers = #tpu.dot_dimension_numbers<[1], [0], [0], [1], [0, 0, 1, 1], [], []>} : vector<16x128xbf16>, vector<128x128xbf16>, vector<16x128xf32> -> vector<16x128xf32>
    %11 = arith.truncf %10 : vector<16x128xf32> to vector<16x128xbf16>
    %c0_7 = arith.constant 0 : index
    %c0_8 = arith.constant 0 : index
    %12 = vector.load %arg5[%c0_7, %c0_8] : memref<16x128xbf16, #tpu.memory_space<vmem>>, vector<16x128xbf16>
    tpu.vector_store %arg5[%c0_7, %c0_8], %11 {strides = array<i32>} : memref<16x128xbf16, #tpu.memory_space<vmem>>, vector<16x128xbf16>,
    %c16_i32 = arith.constant 16 : i32
    %13 = arith.muli %arg0, %c16_i32 : i32
    %14 = tpu.iota {dimensions = array<i32: 0>} : vector<16x128xi32>
    %15 = vector.broadcast %13 : i32 to vector<16x128xi32>
    %16 = arith.addi %15, %14 : vector<16x128xi32>
    %c20_i32 = arith.constant 20 : i32
    %17 = vector.broadcast %c20_i32 : i32 to vector<16x128xi32>
    %18 = arith.cmpi slt, %16, %17 : vector<16x128xi32>
    %cst_9 = arith.constant 0.000000e+00 : f32
    %19 = vector.broadcast %cst_9 : f32 to vector<16x128xf32>
    %20 = arith.select %18, %10, %19 : vector<16x128xi1>, vector<16x128xf32>
    %cst_10 = arith.constant dense<0.000000e+00> : vector<128xf32>
    %21 = vector.multi_reduction <add>, %20, %cst_10 [0] : vector<16x128xf32> to vector<128xf32>
    %22 = vector.shape_cast %21 : vector<128xf32> to vector<1x128xf32>
    %c0_11 = arith.constant 0 : index
    %c0_12 = arith.constant 0 : index
    %c0_13 = arith.constant 0 : index
    %23 = vector.load %arg6[%c0_11, %c0_12, %c0_13] : memref<1x1x128xf32, #tpu.memory_space<vmem>>, vector<1x1x128xf32>
    %24 = vector.shape_cast %23 : vector<1x1x128xf32> to vector<1x128xf32>
    %25 = vector.shape_cast %22 : vector<1x128xf32> to vector<1x1x128xf32>
    tpu.vector_store %arg6[%c0_11, %c0_12, %c0_13], %25 {strides = array<i32>} : memref<1x1x128xf32, #tpu.memory_space<vmem>>, vector<1x1x128xf32>,
    %26 = arith.mulf %20, %20 : vector<16x128xf32>
    %cst_14 = arith.constant dense<0.000000e+00> : vector<128xf32>
    %27 = vector.multi_reduction <add>, %26, %cst_14 [0] : vector<16x128xf32> to vector<128xf32>
    %28 = vector.shape_cast %27 : vector<128xf32> to vector<1x128xf32>
    %c0_15 = arith.constant 0 : index
    %c0_16 = arith.constant 0 : index
    %c0_17 = arith.constant 0 : index
    %29 = vector.load %arg7[%c0_15, %c0_16, %c0_17] : memref<1x1x128xf32, #tpu.memory_space<vmem>>, vector<1x1x128xf32>
    %30 = vector.shape_cast %29 : vector<1x1x128xf32> to vector<1x128xf32>
    %31 = vector.shape_cast %28 : vector<1x128xf32> to vector<1x1x128xf32>
    tpu.vector_store %arg7[%c0_15, %c0_16, %c0_17], %31 {strides = array<i32>} : memref<1x1x128xf32, #tpu.memory_space<vmem>>, vector<1x1x128xf32>,
    return
  }
  func.func @transform_0(%arg0: i32) -> (i32, i32) {
    %c0_i32 = arith.constant 0 : i32
    %c0_i32_0 = arith.constant 0 : i32
    return %arg0, %c0_i32 : i32, i32
  }
  func.func @transform_1(%arg0: i32) -> (i32, i32) {
    %c0_i32 = arith.constant 0 : i32
    %c0_i32_0 = arith.constant 0 : i32
    %c0_i32_1 = arith.constant 0 : i32
    return %c0_i32, %c0_i32_0 : i32, i32
  }
  func.func @transform_2(%arg0: i32) -> (i32, i32) {
    %c0_i32 = arith.constant 0 : i32
    %c0_i32_0 = arith.constant 0 : i32
    %c0_i32_1 = arith.constant 0 : i32
    return %c0_i32, %c0_i32_0 : i32, i32
  }
  func.func @transform_3(%arg0: i32) -> (i32, i32) {
    %c0_i32 = arith.constant 0 : i32
    %c0_i32_0 = arith.constant 0 : i32
    %c0_i32_1 = arith.constant 0 : i32
    return %c0_i32, %c0_i32_0 : i32, i32
  }
  func.func @transform_4(%arg0: i32) -> (i32, i32) {
    %c0_i32 = arith.constant 0 : i32
    %c0_i32_0 = arith.constant 0 : i32
    return %arg0, %c0_i32 : i32, i32
  }
  func.func @transform_5(%arg0: i32) -> (i32, i32, i32) {
    %c0_i32 = arith.constant 0 : i32
    %c0_i32_0 = arith.constant 0 : i32
    %c0_i32_1 = arith.constant 0 : i32
    return %arg0, %c0_i32, %c0_i32_0 : i32, i32, i32
  }
  func.func @transform_6(%arg0: i32) -> (i32, i32, i32) {
    %c0_i32 = arith.constant 0 : i32
    %c0_i32_0 = arith.constant 0 : i32
    %c0_i32_1 = arith.constant 0 : i32
    return %arg0, %c0_i32, %c0_i32_0 : i32, i32, i32
  }
}

module attributes {stable_mosaic.version = 11 : i64} {
  func.func @kernel(%arg0: i32, %arg1: memref<16x128xbf16, #tpu.memory_space<vmem>>, %arg2: memref<1x128xf32, #tpu.memory_space<vmem>>, %arg3: memref<1x128xf32, #tpu.memory_space<vmem>>, %arg4: memref<128x128xbf16, #tpu.memory_space<vmem>>, %arg5: memref<16x128xbf16, #tpu.memory_space<vmem>>, %arg6: memref<1x1x128xf32, #tpu.memory_space<vmem>>, %arg7: memref<1x1x128xf32, #tpu.memory_space<vmem>>) attributes {dimension_semantics = [#tpu.dimension_semantics<parallel>], iteration_bounds = array<i64: 2>, scalar_prefetch = 0 : i64, scratch_operands = 0 : i64, tpu.core_type = #tpu.core_type<tc>, window_params = [{transform_indices = @transform_0, window_bounds = array<i64: 16, 128>}, {pipeline_mode = #tpu.pipeline_mode<synchronous>, transform_indices = @transform_1, window_bounds = array<i64: 1, 128>}, {pipeline_mode = #tpu.pipeline_mode<synchronous>, transform_indices = @transform_2, window_bounds = array<i64: 1, 128>}, {pipeline_mode = #tpu.pipeline_mode<synchronous>, transform_indices = @transform_3, window_bounds = array<i64: 128, 128>}, {transform_indices = @transform_4, window_bounds = array<i64: 16, 128>}, {transform_indices = @transform_5, window_bounds = array<i64: 1, 1, 128>}, {transform_indices = @transform_6, window_bounds = array<i64: 1, 1, 128>}]} {
    %c0 = arith.constant 0 : index
    %c0_0 = arith.constant 0 : index
    %0 = vector.load %arg1[%c0, %c0_0] : memref<16x128xbf16, #tpu.memory_space<vmem>>, vector<16x128xbf16>
    %1 = arith.extf %0 : vector<16x128xbf16> to vector<16x128xf32>
    %c0_1 = arith.constant 0 : index
    %c0_2 = arith.constant 0 : index
    %2 = vector.load %arg2[%c0_1, %c0_2] : memref<1x128xf32, #tpu.memory_space<vmem>>, vector<1x128xf32>
    %3 = vector.broadcast %2 : vector<1x128xf32> to vector<16x128xf32>
    %4 = arith.mulf %1, %3 : vector<16x128xf32>
    %c0_3 = arith.constant 0 : index
    %c0_4 = arith.constant 0 : index
    %5 = vector.load %arg3[%c0_3, %c0_4] : memref<1x128xf32, #tpu.memory_space<vmem>>, vector<1x128xf32>
    %6 = vector.broadcast %5 : vector<1x128xf32> to vector<16x128xf32>
    %7 = arith.addf %4, %6 : vector<16x128xf32>
    %cst = arith.constant 1.000000e-01 : f32
    %8 = vector.broadcast %cst : f32 to vector<16x128xf32>
    %9 = arith.mulf %8, %7 : vector<16x128xf32>
    %10 = arith.maximumf %7, %9 : vector<16x128xf32>
    %11 = arith.truncf %10 : vector<16x128xf32> to vector<16x128xbf16>
    %c0_5 = arith.constant 0 : index
    %c0_6 = arith.constant 0 : index
    %12 = vector.load %arg4[%c0_5, %c0_6] : memref<128x128xbf16, #tpu.memory_space<vmem>>, vector<128x128xbf16>
    %cst_7 = arith.constant dense<0.000000e+00> : vector<16x128xf32>
    %13 = tpu.matmul %11, %12, %cst_7 {dimension_numbers = #tpu.dot_dimension_numbers<[1], [0], [0], [1], [0, 0, 1, 1], [], []>} : vector<16x128xbf16>, vector<128x128xbf16>, vector<16x128xf32> -> vector<16x128xf32>
    %14 = arith.truncf %13 : vector<16x128xf32> to vector<16x128xbf16>
    %c0_8 = arith.constant 0 : index
    %c0_9 = arith.constant 0 : index
    %15 = vector.load %arg5[%c0_8, %c0_9] : memref<16x128xbf16, #tpu.memory_space<vmem>>, vector<16x128xbf16>
    tpu.vector_store %arg5[%c0_8, %c0_9], %14 {strides = array<i32>} : memref<16x128xbf16, #tpu.memory_space<vmem>>, vector<16x128xbf16>,
    %c16_i32 = arith.constant 16 : i32
    %16 = arith.muli %arg0, %c16_i32 : i32
    %17 = tpu.iota {dimensions = array<i32: 0>} : vector<16x128xi32>
    %18 = vector.broadcast %16 : i32 to vector<16x128xi32>
    %19 = arith.addi %18, %17 : vector<16x128xi32>
    %c20_i32 = arith.constant 20 : i32
    %20 = vector.broadcast %c20_i32 : i32 to vector<16x128xi32>
    %21 = arith.cmpi slt, %19, %20 : vector<16x128xi32>
    %cst_10 = arith.constant 0.000000e+00 : f32
    %22 = vector.broadcast %cst_10 : f32 to vector<16x128xf32>
    %23 = arith.select %21, %13, %22 : vector<16x128xi1>, vector<16x128xf32>
    %cst_11 = arith.constant dense<0.000000e+00> : vector<128xf32>
    %24 = vector.multi_reduction <add>, %23, %cst_11 [0] : vector<16x128xf32> to vector<128xf32>
    %25 = vector.shape_cast %24 : vector<128xf32> to vector<1x128xf32>
    %c0_12 = arith.constant 0 : index
    %c0_13 = arith.constant 0 : index
    %c0_14 = arith.constant 0 : index
    %26 = vector.load %arg6[%c0_12, %c0_13, %c0_14] : memref<1x1x128xf32, #tpu.memory_space<vmem>>, vector<1x1x128xf32>
    %27 = vector.shape_cast %26 : vector<1x1x128xf32> to vector<1x128xf32>
    %28 = vector.shape_cast %25 : vector<1x128xf32> to vector<1x1x128xf32>
    tpu.vector_store %arg6[%c0_12, %c0_13, %c0_14], %28 {strides = array<i32>} : memref<1x1x128xf32, #tpu.memory_space<vmem>>, vector<1x1x128xf32>,
    %29 = arith.mulf %23, %23 : vector<16x128xf32>
    %cst_15 = arith.constant dense<0.000000e+00> : vector<128xf32>
    %30 = vector.multi_reduction <add>, %29, %cst_15 [0] : vector<16x128xf32> to vector<128xf32>
    %31 = vector.shape_cast %30 : vector<128xf32> to vector<1x128xf32>
    %c0_16 = arith.constant 0 : index
    %c0_17 = arith.constant 0 : index
    %c0_18 = arith.constant 0 : index
    %32 = vector.load %arg7[%c0_16, %c0_17, %c0_18] : memref<1x1x128xf32, #tpu.memory_space<vmem>>, vector<1x1x128xf32>
    %33 = vector.shape_cast %32 : vector<1x1x128xf32> to vector<1x128xf32>
    %34 = vector.shape_cast %31 : vector<1x128xf32> to vector<1x1x128xf32>
    tpu.vector_store %arg7[%c0_16, %c0_17, %c0_18], %34 {strides = array<i32>} : memref<1x1x128xf32, #tpu.memory_space<vmem>>, vector<1x1x128xf32>,
    return
  }
  func.func @transform_0(%arg0: i32) -> (i32, i32) {
    %c0_i32 = arith.constant 0 : i32
    %c0_i32_0 = arith.constant 0 : i32
    return %arg0, %c0_i32 : i32, i32
  }
  func.func @transform_1(%arg0: i32) -> (i32, i32) {
    %c0_i32 = arith.constant 0 : i32
    %c0_i32_0 = arith.constant 0 : i32
    %c0_i32_1 = arith.constant 0 : i32
    return %c0_i32, %c0_i32_0 : i32, i32
  }
  func.func @transform_2(%arg0: i32) -> (i32, i32) {
    %c0_i32 = arith.constant 0 : i32
    %c0_i32_0 = arith.constant 0 : i32
    %c0_i32_1 = arith.constant 0 : i32
    return %c0_i32, %c0_i32_0 : i32, i32
  }
  func.func @transform_3(%arg0: i32) -> (i32, i32) {
    %c0_i32 = arith.constant 0 : i32
    %c0_i32_0 = arith.constant 0 : i32
    %c0_i32_1 = arith.constant 0 : i32
    return %c0_i32, %c0_i32_0 : i32, i32
  }
  func.func @transform_4(%arg0: i32) -> (i32, i32) {
    %c0_i32 = arith.constant 0 : i32
    %c0_i32_0 = arith.constant 0 : i32
    return %arg0, %c0_i32 : i32, i32
  }
  func.func @transform_5(%arg0: i32) -> (i32, i32, i32) {
    %c0_i32 = arith.constant 0 : i32
    %c0_i32_0 = arith.constant 0 : i32
    %c0_i32_1 = arith.constant 0 : i32
    return %arg0, %c0_i32, %c0_i32_0 : i32, i32, i32
  }
  func.func @transform_6(%arg0: i32) -> (i32, i32, i32) {
    %c0_i32 = arith.constant 0 : i32
    %c0_i32_0 = arith.constant 0 : i32
    %c0_i32_1 = arith.constant 0 : i32
    return %arg0, %c0_i32, %c0_i32_0 : i32, i32, i32
  }
}

module attributes {stable_mosaic.version = 11 : i64} {
  func.func @kernel(%arg0: i32, %arg1: memref<16x128xbf16, #tpu.memory_space<vmem>>, %arg2: memref<1x128xf32, #tpu.memory_space<vmem>>, %arg3: memref<1x128xf32, #tpu.memory_space<vmem>>, %arg4: memref<128x128xbf16, #tpu.memory_space<vmem>>, %arg5: memref<1x128xf32, #tpu.memory_space<vmem>>, %arg6: memref<16x128xf32, #tpu.memory_space<vmem>>) attributes {dimension_semantics = [#tpu.dimension_semantics<parallel>], iteration_bounds = array<i64: 2>, scalar_prefetch = 0 : i64, scratch_operands = 0 : i64, tpu.core_type = #tpu.core_type<tc>, window_params = [{transform_indices = @transform_0, window_bounds = array<i64: 16, 128>}, {pipeline_mode = #tpu.pipeline_mode<synchronous>, transform_indices = @transform_1, window_bounds = array<i64: 1, 128>}, {pipeline_mode = #tpu.pipeline_mode<synchronous>, transform_indices = @transform_2, window_bounds = array<i64: 1, 128>}, {pipeline_mode = #tpu.pipeline_mode<synchronous>, transform_indices = @transform_3, window_bounds = array<i64: 128, 128>}, {pipeline_mode = #tpu.pipeline_mode<synchronous>, transform_indices = @transform_4, window_bounds = array<i64: 1, 128>}, {transform_indices = @transform_5, window_bounds = array<i64: 16, 128>}]} {
    %c0 = arith.constant 0 : index
    %c0_0 = arith.constant 0 : index
    %0 = vector.load %arg1[%c0, %c0_0] : memref<16x128xbf16, #tpu.memory_space<vmem>>, vector<16x128xbf16>
    %1 = arith.extf %0 : vector<16x128xbf16> to vector<16x128xf32>
    %c0_1 = arith.constant 0 : index
    %c0_2 = arith.constant 0 : index
    %2 = vector.load %arg2[%c0_1, %c0_2] : memref<1x128xf32, #tpu.memory_space<vmem>>, vector<1x128xf32>
    %3 = vector.broadcast %2 : vector<1x128xf32> to vector<16x128xf32>
    %4 = arith.mulf %1, %3 : vector<16x128xf32>
    %c0_3 = arith.constant 0 : index
    %c0_4 = arith.constant 0 : index
    %5 = vector.load %arg3[%c0_3, %c0_4] : memref<1x128xf32, #tpu.memory_space<vmem>>, vector<1x128xf32>
    %6 = vector.broadcast %5 : vector<1x128xf32> to vector<16x128xf32>
    %7 = arith.addf %4, %6 : vector<16x128xf32>
    %cst = arith.constant 1.000000e-01 : f32
    %8 = vector.broadcast %cst : f32 to vector<16x128xf32>
    %9 = arith.mulf %8, %7 : vector<16x128xf32>
    %10 = arith.maximumf %7, %9 : vector<16x128xf32>
    %11 = arith.truncf %10 : vector<16x128xf32> to vector<16x128xbf16>
    %c0_5 = arith.constant 0 : index
    %c0_6 = arith.constant 0 : index
    %12 = vector.load %arg4[%c0_5, %c0_6] : memref<128x128xbf16, #tpu.memory_space<vmem>>, vector<128x128xbf16>
    %cst_7 = arith.constant dense<0.000000e+00> : vector<16x128xf32>
    %13 = tpu.matmul %11, %12, %cst_7 {dimension_numbers = #tpu.dot_dimension_numbers<[1], [0], [0], [1], [0, 0, 1, 1], [], []>} : vector<16x128xbf16>, vector<128x128xbf16>, vector<16x128xf32> -> vector<16x128xf32>
    %c0_8 = arith.constant 0 : index
    %c0_9 = arith.constant 0 : index
    %14 = vector.load %arg5[%c0_8, %c0_9] : memref<1x128xf32, #tpu.memory_space<vmem>>, vector<1x128xf32>
    %15 = vector.broadcast %14 : vector<1x128xf32> to vector<16x128xf32>
    %16 = arith.addf %13, %15 : vector<16x128xf32>
    %c0_10 = arith.constant 0 : index
    %c0_11 = arith.constant 0 : index
    %17 = vector.load %arg6[%c0_10, %c0_11] : memref<16x128xf32, #tpu.memory_space<vmem>>, vector<16x128xf32>
    tpu.vector_store %arg6[%c0_10, %c0_11], %16 {strides = array<i32>} : memref<16x128xf32, #tpu.memory_space<vmem>>, vector<16x128xf32>,
    return
  }
  func.func @transform_0(%arg0: i32) -> (i32, i32) {
    %c0_i32 = arith.constant 0 : i32
    %c0_i32_0 = arith.constant 0 : i32
    return %arg0, %c0_i32 : i32, i32
  }
  func.func @transform_1(%arg0: i32) -> (i32, i32) {
    %c0_i32 = arith.constant 0 : i32
    %c0_i32_0 = arith.constant 0 : i32
    %c0_i32_1 = arith.constant 0 : i32
    return %c0_i32, %c0_i32_0 : i32, i32
  }
  func.func @transform_2(%arg0: i32) -> (i32, i32) {
    %c0_i32 = arith.constant 0 : i32
    %c0_i32_0 = arith.constant 0 : i32
    %c0_i32_1 = arith.constant 0 : i32
    return %c0_i32, %c0_i32_0 : i32, i32
  }
  func.func @transform_3(%arg0: i32) -> (i32, i32) {
    %c0_i32 = arith.constant 0 : i32
    %c0_i32_0 = arith.constant 0 : i32
    %c0_i32_1 = arith.constant 0 : i32
    return %c0_i32, %c0_i32_0 : i32, i32
  }
  func.func @transform_4(%arg0: i32) -> (i32, i32) {
    %c0_i32 = arith.constant 0 : i32
    %c0_i32_0 = arith.constant 0 : i32
    %c0_i32_1 = arith.constant 0 : i32
    return %c0_i32, %c0_i32_0 : i32, i32
  }
  func.func @transform_5(%arg0: i32) -> (i32, i32) {
    %c0_i32 = arith.constant 0 : i32
    %c0_i32_0 = arith.constant 0 : i32
    return %arg0, %c0_i32 : i32, i32
  }
}

</mosaic_0001>

<bundles_post_ra>
// kernel: mlp_forward.4
= control target key start
LH: loop header
LB: loop body
LE: loop exit
PB: predicated region body
PF: predicated region fallthrough
CT: control target
= control target key end

     0   :  { %s289_s9 = smov 0   ;;  %s309_s0 = inlined_call_operand.vmem [shape: bf16[32,128], index: 0, kind: input, shape index: {}]   ;;  %s310_s1 = inlined_call_operand.vmem [shape: f32[2,1,128], index: 1, kind: output, shape index: {0}]   ;;  %s311_s2 = inlined_call_operand.vmem [shape: f32[2,1,128], index: 2, kind: output, shape index: {1}]  }
   0x1 LB: > { %s245_s10 = sadd.s32 4294967295, %s272_s9   ;;  %p249_p0 = scmp.ge.s32.totalorder %s272_s9, 1  ;;  %s272_s9 = sphi %s289_s9, %s13_s9  }
   0x2   : > { %p116_p1 = scmp.lt.s32.totalorder %s272_s9, 3 }
   0x4   : > { %p117_p2 = pnand %p249_p0, %p116_p1 }
   0x5   : > { %s250_s11 = sshll.u32 (!%p117_p2), %s245_s10, 1  ;;  %p145_p4 = scmp.lt.s32.totalorder (!%p117_p2), %s245_s10, 1 }
   0x6   : > { %120 = sbr.rel (%p117_p2) target bundleno = 36 (0x24), region = 24  ;;  %p140_p3 = scmp.lt.s32.totalorder (!%p117_p2), %s250_s11, 3 }
   0xd   : > { %s313_s11 = smov (!%p140_p3, %s250_s11), 3  ;;  %s315_s10 = smov (!%p145_p4, %s245_s10), 1 }
   0xe   : > { %s251_s12 = sshll.u32 %s313_s11, 2  ;;  %s147_s18 = scalar_lea.vmem %s310_s1, %s315_s10 }
   0xf   : > { %s143_s15 = scalar_lea.vmem %s309_s0, %s251_s12  ;;  %s150_s21 = scalar_lea.vmem %s311_s2, %s315_s10 }
  0x10   : > { %v255_v0 = vld [vmem:[%s143_s15] sm:$0xff]  }
  0x11   : > { %v256_v1 = vunpack.c.l.bf16 %v255_v0  ;;  %v257_v2 = vunpack.c.h.bf16 %v255_v0 }
  0x13   : > { %v155_v3 = vadd.f32 %v257_v2, %v256_v1  ;;  %v163_v4 = vmul.f32 %v256_v1, %v256_v1  ;;  %v164_v5 = vmul.f32 %v257_v2, %v257_v2 }
  0x15   : > { %v156_v6 = vrot.slane %v155_v3, 4  ;;  %v165_v7 = vadd.f32 %v164_v5, %v163_v4 }
  0x17   : > { %v157_v8 = vadd.f32 %v156_v6, %v155_v3  ;;  %v166_v9 = vrot.slane %v165_v7, 4 }
  0x19   : > { %v158_v10 = vrot.slane %v157_v8, 2  ;;  %v167_v11 = vadd.f32 %v166_v9, %v165_v7 }
  0x1b   : > { %v159_v12 = vadd.f32 %v158_v10, %v157_v8  ;;  %v168_v13 = vrot.slane %v167_v11, 2 }
  0x1d   : > { %v160_v14 = vrot.slane %v159_v12, 1  ;;  %v169_v15 = vadd.f32 %v168_v13, %v167_v11 }
  0x1f   : > { %v161_v16 = vadd.f32 %v160_v14, %v159_v12  ;;  %v170_v17 = vrot.slane %v169_v15, 1 }
  0x21   : > { %162 = vst [vmem:[%s147_s18] sm:$0x1] %v161_v16  ;;  %v171_v18 = vadd.f32 %v170_v17, %v169_v15 }
  0x23   : > { %172 = vst [vmem:[%s150_s21] sm:$0x1] %v171_v18 }
  0x24 PF: > { %s13_s9 = sadd.s32 1, %s272_s9  }
  0x25   : > { %p10_p5 = scmp.ge.s32.totalorder %s13_s9, 4  }
  0x27   :  { %12 = sbr.rel (!%p10_p5) target bundleno = 1 (0x1), region = 66 }

// kernel: mlp_forward.5
= control target key start
LH: loop header
LB: loop body
LE: loop exit
PB: predicated region body
PF: predicated region fallthrough
CT: control target
= control target key end

     0   :  { %s673_s21 = smov 0   ;;  %s739_s0 = inlined_call_operand.vmem [shape: bf16[32,128], index: 0, kind: input, shape index: {}]   ;;  %s740_s1 = inlined_call_operand.vmem [shape: f32[1,128], index: 1, kind: input, shape index: {}]   ;;  %s741_s2 = inlined_call_operand.vmem [shape: f32[1,128], index: 2, kind: input, shape index: {}]   ;;  %s742_s3 = inlined_call_operand.vmem [shape: bf16[128,128], index: 3, kind: input, shape index: {}]   ;;  %s743_s4 = inlined_call_operand.vmem [shape: bf16[32,128], index: 4, kind: output, shape index: {0}]   ;;  %s744_s5 = inlined_call_operand.vmem [shape: f32[2,1,128], index: 5, kind: output, shape index: {1}]   ;;  %s745_s6 = inlined_call_operand.vmem [shape: f32[2,1,128], index: 6, kind: output, shape index: {2}]  }
   0x1 LB: > { %s679_s22 = sadd.s32 4294967295, %s634_s21   ;;  %p550_p0 = scmp.ge.s32.totalorder %s634_s21, 1  ;;  %s634_s21 = sphi %s673_s21, %s17_s21  }
   0x2   : > { %p218_p1 = scmp.lt.s32.totalorder %s634_s21, 3 }
   0x4   : > { %p219_p2 = pnand %p550_p0, %p218_p1 }
   0x5   : > { %v620_v0 = vld [vmem:[%s742_s3] sm:$0xff] (!%p219_p2)   ;;  %v636_v1 = vmov (!%p219_p2), 0.0   ;;  %v621_v2 = vld [vmem:[%s742_s3 + $0x8] sm:$0xff] (!%p219_p2)   ;;  %vm637_vm0 = vmmov (!%p219_p2), 0   ;;  %s551_s27 = sshll.u32 (!%p219_p2), %s679_s22, 1  ;;  %v622_v3 = vld [vmem:[%s742_s3 + $0x10] sm:$0xff] (!%p219_p2)   ;;  %v412_v19 = vlaneseq (!%p219_p2) }
   0x6   : > { %222 = sbr.rel (%p219_p2) target bundleno = 270 (0x10e), region = 36  ;;  %590 = vmatprep.subr.bf16.mxu0 (!%p219_p2), %v636_v1  ;;  %606 = vmatprep.mubr.msk.bf16.mxu0 (!%p219_p2), %vm637_vm0, %v636_v1  ;;  %p255_p3 = scmp.lt.s32.totalorder (!%p219_p2), %s551_s27, 3  ;;  %v623_v4 = vld [vmem:[%s742_s3 + $0x18] sm:$0xff] (!%p219_p2)   ;;  %v624_v5 = vld [vmem:[%s742_s3 + $0x20] sm:$0xff] (!%p219_p2)   ;;  %v625_v9 = vld [vmem:[%s742_s3 + $0x28] sm:$0xff] (!%p219_p2)  }
   0x7   : > { %591 = vmatpush3.bf16.msra.mxu0 (!%p219_p2), %v620_v0  ;;  %v555_v10 = vld [vmem:[%s740_s1] ss:$0 sm:$0xff] (!%p219_p2)  ;;  %v626_v13 = vld [vmem:[%s742_s3 + $0x30] sm:$0xff] (!%p219_p2)   ;;  %v627_v17 = vld [vmem:[%s742_s3 + $0x38] sm:$0xff] (!%p219_p2)   ;;  %s567_s26 = sshll.u32 (!%p219_p2), %s679_s22, 4  ;;  %v413_v20 = vshrl.u32 (!%p219_p2), %v412_v19, 7 }
   0x8   : > { %592 = vmatprep.subr.bf16.mxu0 (!%p219_p2), %v636_v1  ;;  %v556_v14 = vld [vmem:[%s741_s2] ss:$0 sm:$0xff] (!%p219_p2)  ;;  %v415_v21 = vstv (!%p219_p2), %s567_s26  ;;  %p266_p4 = scmp.lt.s32.totalorder (!%p219_p2), %s679_s22, 1 }
   0x9   : > { %v414_v22 = vadd.s32 (!%p219_p2), 8, %v413_v20  ;;  %v416_v23 = vadd.s32 (!%p219_p2), %v415_v21, %v413_v20 }
   0xb   : > { %593 = vmatpush3.bf16.msra.mxu0 (!%p219_p2), %v621_v2  ;;  %v417_v24 = vadd.s32 (!%p219_p2), %v415_v21, %v414_v22  ;;  %vm418_vm1 = vcmp.lt.s32.totalorder (!%p219_p2), %v416_v23, 20 }
   0xc   : > { %594 = vmatprep.subr.bf16.mxu0 (!%p219_p2), %v636_v1 }
   0xd   : > { %s747_s27 = smov (!%p255_p3, %s551_s27), 3  ;;  %vm419_vm2 = vcmp.lt.s32.totalorder %v417_v24, 20  ;;  %s749_s22 = smov (!%p266_p4, %s679_s22), 1 }
   0xe   : > { %s552_s30 = sshll.u32 %s747_s27, 2  ;;  %s268_s8 = scalar_lea.vmem %s744_s5, %s749_s22 }
   0xf   : > { %595 = vmatpush3.bf16.msra.mxu0 %v622_v3  ;;  %s258_s11 = scalar_lea.vmem %s739_s0, %s552_s30  ;;  %s264_s7 = scalar_lea.vmem %s743_s4, %s552_s30 }
  0x10   : > { %596 = vmatprep.subr.bf16.mxu0 %v636_v1  ;;  %v573_v6 = vld [vmem:[%s258_s11] sm:$0xff]   ;;  %s271_s11 = scalar_lea.vmem %s745_s6, %s749_s22 }
  0x11   : > { %v574_v7 = vunpack.c.l.bf16 %v573_v6  ;;  %v575_v8 = vunpack.c.h.bf16 %v573_v6 }
  0x13   : > { %597 = vmatpush3.bf16.msra.mxu0 %v623_v4  ;;  %v284_v11 = vmul.f32 %v574_v7, %v555_v10  ;;  %v285_v12 = vmul.f32 %v575_v8, %v555_v10 }
  0x14   : > { %598 = vmatprep.subr.bf16.mxu0 %v636_v1 }
  0x15   : > { %v293_v15 = vadd.f32 %v556_v14, %v284_v11  ;;  %v294_v16 = vadd.f32 %v556_v14, %v285_v12 }
  0x17   : > { %599 = vmatpush3.bf16.msra.mxu0 %v624_v5  ;;  %v295_v18 = vpack.c.bf16 %v294_v16, %v293_v15 }
  0x18   : > { %600 = vmatprep.subr.bf16.mxu0 %v636_v1 }
  0x1b   : > { %601 = vmatpush3.bf16.msra.mxu0 %v625_v9 }
  0x1c   : > { %602 = vmatprep.subr.bf16.mxu0 %v636_v1 }
  0x1f   : > { %603 = vmatpush3.bf16.msra.mxu0 %v626_v13 }
  0x20   : > { %604 = vmatprep.subr.bf16.mxu0 %v636_v1 }
  0x23   : > { %605 = vmatpush3.bf16.msra.mxu0 %v627_v17 }
  0x26   : > { %607 = vmatmul.mubr.bf16.vlgmr.msra.gmra.mrb[0].mxu0 %v295_v18 }
  0xf9   : > { %v394_v25 = vpop.f32.mrb[0].mxu0 }
  0xfa   : > { %v420_v26 = vsel %vm418_vm1, %v394_v25, 0.0  ;;  %v608_v27 = vpop.f32.mrb[1].mxu0 }
  0xfb   : > { %v397_v28 = vpop.f32.mrb[2].mxu0  ;;  %v430_v32 = vmul.f32 %v420_v26, %v420_v26 }
  0xfc   : > { %v579_v29 = vpack.c.bf16 %v397_v28, %v394_v25  ;;  %v421_v30 = vsel %vm419_vm2, %v397_v28, 0.0  ;;  %v609_v31 = vpop.f32.mrb[3].mxu0 }
  0xfd   : > { %v422_v33 = vadd.f32 %v421_v30, %v420_v26  ;;  %v431_v34 = vmul.f32 %v421_v30, %v421_v30 }
  0xfe   : > { %580 = vst [vmem:[%s264_s7] sm:$0xff] %v579_v29  }
  0xff   : > { %v423_v35 = vrot.slane %v422_v33, 4  ;;  %v432_v36 = vadd.f32 %v431_v34, %v430_v32 }
 0x101   : > { %v424_v37 = vadd.f32 %v423_v35, %v422_v33  ;;  %v433_v38 = vrot.slane %v432_v36, 4 }
 0x103   : > { %v425_v39 = vrot.slane %v424_v37, 2  ;;  %v434_v40 = vadd.f32 %v433_v38, %v432_v36 }
 0x105   : > { %v426_v41 = vadd.f32 %v425_v39, %v424_v37  ;;  %v435_v42 = vrot.slane %v434_v40, 2 }
 0x107   : > { %v427_v43 = vrot.slane %v426_v41, 1  ;;  %v436_v44 = vadd.f32 %v435_v42, %v434_v40 }
 0x109   : > { %v428_v45 = vadd.f32 %v427_v43, %v426_v41  ;;  %v437_v46 = vrot.slane %v436_v44, 1 }
 0x10b   : > { %429 = vst [vmem:[%s268_s8] sm:$0x1] %v428_v45  ;;  %v438_v47 = vadd.f32 %v437_v46, %v436_v44 }
 0x10d   : > { %439 = vst [vmem:[%s271_s11] sm:$0x1] %v438_v47 }
 0x10e PF: > { %s17_s21 = sadd.s32 1, %s634_s21  }
 0x10f   : > { %p14_p5 = scmp.ge.s32.totalorder %s17_s21, 4  }
 0x111   :  { %16 = sbr.rel (!%p14_p5) target bundleno = 1 (0x1), region = 90 }

// kernel: mlp_forward.6
= control target key start
LH: loop header
LB: loop body
LE: loop exit
PB: predicated region body
PF: predicated region fallthrough
CT: control target
= control target key end

     0   :  { %s677_s21 = smov 0   ;;  %s743_s0 = inlined_call_operand.vmem [shape: bf16[32,128], index: 0, kind: input, shape index: {}]   ;;  %s744_s1 = inlined_call_operand.vmem [shape: f32[1,128], index: 1, kind: input, shape index: {}]   ;;  %s745_s2 = inlined_call_operand.vmem [shape: f32[1,128], index: 2, kind: input, shape index: {}]   ;;  %s746_s3 = inlined_call_operand.vmem [shape: bf16[128,128], index: 3, kind: input, shape index: {}]   ;;  %s747_s4 = inlined_call_operand.vmem [shape: bf16[32,128], index: 4, kind: output, shape index: {0}]   ;;  %s748_s5 = inlined_call_operand.vmem [shape: f32[2,1,128], index: 5, kind: output, shape index: {1}]   ;;  %s749_s6 = inlined_call_operand.vmem [shape: f32[2,1,128], index: 6, kind: output, shape index: {2}]  }
   0x1 LB: > { %s683_s22 = sadd.s32 4294967295, %s638_s21   ;;  %p554_p0 = scmp.ge.s32.totalorder %s638_s21, 1  ;;  %s638_s21 = sphi %s677_s21, %s17_s21  }
   0x2   : > { %p218_p1 = scmp.lt.s32.totalorder %s638_s21, 3 }
   0x4   : > { %p219_p2 = pnand %p554_p0, %p218_p1 }
   0x5   : > { %v624_v0 = vld [vmem:[%s746_s3] sm:$0xff] (!%p219_p2)   ;;  %v640_v1 = vmov (!%p219_p2), 0.0   ;;  %v625_v2 = vld [vmem:[%s746_s3 + $0x8] sm:$0xff] (!%p219_p2)   ;;  %vm641_vm0 = vmmov (!%p219_p2), 0   ;;  %s555_s27 = sshll.u32 (!%p219_p2), %s683_s22, 1  ;;  %v626_v3 = vld [vmem:[%s746_s3 + $0x10] sm:$0xff] (!%p219_p2)   ;;  %v416_v23 = vlaneseq (!%p219_p2) }
   0x6   : > { %222 = sbr.rel (%p219_p2) target bundleno = 270 (0x10e), region = 36  ;;  %594 = vmatprep.subr.bf16.mxu0 (!%p219_p2), %v640_v1  ;;  %610 = vmatprep.mubr.msk.bf16.mxu0 (!%p219_p2), %vm641_vm0, %v640_v1  ;;  %p255_p3 = scmp.lt.s32.totalorder (!%p219_p2), %s555_s27, 3  ;;  %v627_v5 = vld [vmem:[%s746_s3 + $0x18] sm:$0xff] (!%p219_p2)   ;;  %v559_v8 = vld [vmem:[%s744_s1] ss:$0 sm:$0xff] (!%p219_p2)  ;;  %v629_v15 = vld [vmem:[%s746_s3 + $0x28] sm:$0xff] (!%p219_p2)  }
   0x7   : > { %595 = vmatpush3.bf16.msra.mxu0 (!%p219_p2), %v624_v0  ;;  %v628_v11 = vld [vmem:[%s746_s3 + $0x20] sm:$0xff] (!%p219_p2)   ;;  %v630_v18 = vld [vmem:[%s746_s3 + $0x30] sm:$0xff] (!%p219_p2)   ;;  %v631_v21 = vld [vmem:[%s746_s3 + $0x38] sm:$0xff] (!%p219_p2)   ;;  %s571_s26 = sshll.u32 (!%p219_p2), %s683_s22, 4  ;;  %v417_v24 = vshrl.u32 (!%p219_p2), %v416_v23, 7  ;;  %p266_p4 = scmp.lt.s32.totalorder (!%p219_p2), %s683_s22, 1 }
   0x8   : > { %596 = vmatprep.subr.bf16.mxu0 (!%p219_p2), %v640_v1  ;;  %v560_v12 = vld [vmem:[%s745_s2] ss:$0 sm:$0xff] (!%p219_p2)  ;;  %v419_v25 = vstv (!%p219_p2), %s571_s26 }
   0x9   : > { %v418_v26 = vadd.s32 (!%p219_p2), 8, %v417_v24  ;;  %v420_v27 = vadd.s32 (!%p219_p2), %v419_v25, %v417_v24 }
   0xb   : > { %597 = vmatpush3.bf16.msra.mxu0 (!%p219_p2), %v625_v2  ;;  %v421_v28 = vadd.s32 (!%p219_p2), %v419_v25, %v418_v26  ;;  %vm422_vm1 = vcmp.lt.s32.totalorder (!%p219_p2), %v420_v27, 20 }
   0xc   : > { %598 = vmatprep.subr.bf16.mxu0 (!%p219_p2), %v640_v1 }
   0xd   : > { %s751_s27 = smov (!%p255_p3, %s555_s27), 3  ;;  %vm423_vm2 = vcmp.lt.s32.totalorder %v421_v28, 20  ;;  %s753_s22 = smov (!%p266_p4, %s683_s22), 1 }
   0xe   : > { %s556_s30 = sshll.u32 %s751_s27, 2  ;;  %s268_s8 = scalar_lea.vmem %s748_s5, %s753_s22 }
   0xf   : > { %s258_s9 = scalar_lea.vmem %s743_s0, %s556_s30  ;;  %599 = vmatpush3.bf16.msra.mxu0 %v626_v3  ;;  %s264_s7 = scalar_lea.vmem %s747_s4, %s556_s30 }
  0x10   : > { %v577_v4 = vld [vmem:[%s258_s9] sm:$0xff]   ;;  %600 = vmatprep.subr.bf16.mxu0 %v640_v1  ;;  %s271_s11 = scalar_lea.vmem %s749_s6, %s753_s22 }
  0x11   : > { %v578_v6 = vunpack.c.l.bf16 %v577_v4  ;;  %v579_v7 = vunpack.c.h.bf16 %v577_v4 }
  0x13   : > { %v284_v9 = vmul.f32 %v578_v6, %v559_v8  ;;  %v285_v10 = vmul.f32 %v579_v7, %v559_v8  ;;  %601 = vmatpush3.bf16.msra.mxu0 %v627_v5 }
  0x14   : > { %602 = vmatprep.subr.bf16.mxu0 %v640_v1 }
  0x15   : > { %v293_v13 = vadd.f32 %v560_v12, %v284_v9  ;;  %v294_v14 = vadd.f32 %v560_v12, %v285_v10 }
  0x17   : > { %603 = vmatpush3.bf16.msra.mxu0 %v628_v11  ;;  %v295_v16 = vmul.f32 0.1, %v293_v13  ;;  %v296_v17 = vmul.f32 0.1, %v294_v14 }
  0x18   : > { %604 = vmatprep.subr.bf16.mxu0 %v640_v1 }
  0x19   : > { %v297_v19 = vmax.f32 %v293_v13, %v295_v16  ;;  %v298_v20 = vmax.f32 %v294_v14, %v296_v17 }
  0x1b   : > { %605 = vmatpush3.bf16.msra.mxu0 %v629_v15  ;;  %v299_v22 = vpack.c.bf16 %v298_v20, %v297_v19 }
  0x1c   : > { %606 = vmatprep.subr.bf16.mxu0 %v640_v1 }
  0x1f   : > { %607 = vmatpush3.bf16.msra.mxu0 %v630_v18 }
  0x20   : > { %608 = vmatprep.subr.bf16.mxu0 %v640_v1 }
  0x23   : > { %609 = vmatpush3.bf16.msra.mxu0 %v631_v21 }
  0x26   : > { %611 = vmatmul.mubr.bf16.vlgmr.msra.gmra.mrb[0].mxu0 %v299_v22 }
  0xf9   : > { %v398_v29 = vpop.f32.mrb[0].mxu0 }
  0xfa   : > { %v424_v30 = vsel %vm422_vm1, %v398_v29, 0.0  ;;  %v612_v31 = vpop.f32.mrb[1].mxu0 }
  0xfb   : > { %v401_v32 = vpop.f32.mrb[2].mxu0  ;;  %v434_v36 = vmul.f32 %v424_v30, %v424_v30 }
  0xfc   : > { %v583_v33 = vpack.c.bf16 %v401_v32, %v398_v29  ;;  %v425_v34 = vsel %vm423_vm2, %v401_v32, 0.0  ;;  %v613_v35 = vpop.f32.mrb[3].mxu0 }
  0xfd   : > { %v426_v37 = vadd.f32 %v425_v34, %v424_v30  ;;  %v435_v38 = vmul.f32 %v425_v34, %v425_v34 }
  0xfe   : > { %584 = vst [vmem:[%s264_s7] sm:$0xff] %v583_v33  }
  0xff   : > { %v427_v39 = vrot.slane %v426_v37, 4  ;;  %v436_v40 = vadd.f32 %v435_v38, %v434_v36 }
 0x101   : > { %v428_v41 = vadd.f32 %v427_v39, %v426_v37  ;;  %v437_v42 = vrot.slane %v436_v40, 4 }
 0x103   : > { %v429_v43 = vrot.slane %v428_v41, 2  ;;  %v438_v44 = vadd.f32 %v437_v42, %v436_v40 }
 0x105   : > { %v430_v45 = vadd.f32 %v429_v43, %v428_v41  ;;  %v439_v46 = vrot.slane %v438_v44, 2 }
 0x107   : > { %v431_v47 = vrot.slane %v430_v45, 1  ;;  %v440_v48 = vadd.f32 %v439_v46, %v438_v44 }
 0x109   : > { %v432_v49 = vadd.f32 %v431_v47, %v430_v45  ;;  %v441_v50 = vrot.slane %v440_v48, 1 }
 0x10b   : > { %433 = vst [vmem:[%s268_s8] sm:$0x1] %v432_v49  ;;  %v442_v51 = vadd.f32 %v441_v50, %v440_v48 }
 0x10d   : > { %443 = vst [vmem:[%s271_s11] sm:$0x1] %v442_v51 }
 0x10e PF: > { %s17_s21 = sadd.s32 1, %s638_s21  }
 0x10f   : > { %p14_p5 = scmp.ge.s32.totalorder %s17_s21, 4  }
 0x111   :  { %16 = sbr.rel (!%p14_p5) target bundleno = 1 (0x1), region = 90 }

// kernel: mlp_forward.7
= control target key start
LH: loop header
LB: loop body
LE: loop exit
PB: predicated region body
PF: predicated region fallthrough
CT: control target
= control target key end

     0   :  { %s539_s18 = smov 0   ;;  %s593_s0 = inlined_call_operand.vmem [shape: bf16[32,128], index: 0, kind: input, shape index: {}]   ;;  %s594_s1 = inlined_call_operand.vmem [shape: f32[1,128], index: 1, kind: input, shape index: {}]   ;;  %s595_s2 = inlined_call_operand.vmem [shape: f32[1,128], index: 2, kind: input, shape index: {}]   ;;  %s596_s3 = inlined_call_operand.vmem [shape: bf16[128,128], index: 3, kind: input, shape index: {}]   ;;  %s597_s4 = inlined_call_operand.vmem [shape: f32[1,128], index: 4, kind: input, shape index: {}]   ;;  %s598_s5 = inlined_call_operand.vmem [shape: f32[32,128], index: 5, kind: output, shape index: {}]  }
   0x1 LB: > { %s426_s19 = sadd.s32 4294967295, %s505_s18   ;;  %p430_p0 = scmp.ge.s32.totalorder %s505_s18, 1  ;;  %s505_s18 = sphi %s539_s18, %s15_s18  }
   0x2   : > { %p188_p1 = scmp.lt.s32.totalorder %s505_s18, 3 }
   0x4   : > { %p189_p2 = pnand %p430_p0, %p188_p1 }
   0x5   : > { %v491_v0 = vld [vmem:[%s596_s3] sm:$0xff] (!%p189_p2)   ;;  %v507_v1 = vmov (!%p189_p2), 0.0   ;;  %v492_v2 = vld [vmem:[%s596_s3 + $0x8] sm:$0xff] (!%p189_p2)   ;;  %vm508_vm0 = vmmov (!%p189_p2), 0   ;;  %s431_s24 = sshll.u32 (!%p189_p2), %s426_s19, 1  ;;  %v493_v3 = vld [vmem:[%s596_s3 + $0x10] sm:$0xff] (!%p189_p2)  }
   0x6   : > { %192 = sbr.rel (%p189_p2) target bundleno = 255 (0xff), region = 40  ;;  %461 = vmatprep.subr.bf16.mxu0 (!%p189_p2), %v507_v1  ;;  %477 = vmatprep.mubr.msk.bf16.mxu0 (!%p189_p2), %vm508_vm0, %v507_v1  ;;  %p217_p3 = scmp.lt.s32.totalorder (!%p189_p2), %s431_s24, 3  ;;  %v494_v5 = vld [vmem:[%s596_s3 + $0x18] sm:$0xff] (!%p189_p2)   ;;  %v435_v8 = vld [vmem:[%s594_s1] ss:$0 sm:$0xff] (!%p189_p2)  ;;  %v496_v15 = vld [vmem:[%s596_s3 + $0x28] sm:$0xff] (!%p189_p2)  }
   0x7   : > { %462 = vmatpush3.bf16.msra.mxu0 (!%p189_p2), %v491_v0  ;;  %v495_v11 = vld [vmem:[%s596_s3 + $0x20] sm:$0xff] (!%p189_p2)   ;;  %v497_v18 = vld [vmem:[%s596_s3 + $0x30] sm:$0xff] (!%p189_p2)   ;;  %v498_v21 = vld [vmem:[%s596_s3 + $0x38] sm:$0xff] (!%p189_p2)  }
   0x8   : > { %463 = vmatprep.subr.bf16.mxu0 (!%p189_p2), %v507_v1  ;;  %v436_v12 = vld [vmem:[%s595_s2] ss:$0 sm:$0xff] (!%p189_p2) }
   0x9   : > { %v437_v23 = vld [vmem:[%s597_s4] ss:$0 sm:$0xff] (!%p189_p2) }
   0xb   : > { %464 = vmatpush3.bf16.msra.mxu0 (!%p189_p2), %v492_v2 }
   0xc   : > { %465 = vmatprep.subr.bf16.mxu0 (!%p189_p2), %v507_v1 }
   0xd   : > { %s600_s24 = smov (!%p217_p3, %s431_s24), 3 }
   0xe   : > { %s432_s27 = sshll.u32 %s600_s24, 2  ;;  %s434_s21 = sshll.u32 %s600_s24, 3 }
   0xf   : > { %s220_s30 = scalar_lea.vmem %s593_s0, %s432_s27  ;;  %466 = vmatpush3.bf16.msra.mxu0 %v493_v3  ;;  %s226_s27 = scalar_lea.vmem %s598_s5, %s434_s21 }
  0x10   : > { %v449_v4 = vld [vmem:[%s220_s30] sm:$0xff]   ;;  %467 = vmatprep.subr.bf16.mxu0 %v507_v1 }
  0x11   : > { %v450_v6 = vunpack.c.l.bf16 %v449_v4  ;;  %v451_v7 = vunpack.c.h.bf16 %v449_v4 }
  0x13   : > { %v240_v9 = vmul.f32 %v450_v6, %v435_v8  ;;  %v241_v10 = vmul.f32 %v451_v7, %v435_v8  ;;  %468 = vmatpush3.bf16.msra.mxu0 %v494_v5 }
  0x14   : > { %469 = vmatprep.subr.bf16.mxu0 %v507_v1 }
  0x15   : > { %v249_v13 = vadd.f32 %v436_v12, %v240_v9  ;;  %v250_v14 = vadd.f32 %v436_v12, %v241_v10 }
  0x17   : > { %470 = vmatpush3.bf16.msra.mxu0 %v495_v11  ;;  %v251_v16 = vmul.f32 0.1, %v249_v13  ;;  %v252_v17 = vmul.f32 0.1, %v250_v14 }
  0x18   : > { %471 = vmatprep.subr.bf16.mxu0 %v507_v1 }
  0x19   : > { %v253_v19 = vmax.f32 %v249_v13, %v251_v16  ;;  %v254_v20 = vmax.f32 %v250_v14, %v252_v17 }
  0x1b   : > { %472 = vmatpush3.bf16.msra.mxu0 %v496_v15  ;;  %v255_v22 = vpack.c.bf16 %v254_v20, %v253_v19 }
  0x1c   : > { %473 = vmatprep.subr.bf16.mxu0 %v507_v1 }
  0x1f   : > { %474 = vmatpush3.bf16.msra.mxu0 %v497_v18 }
  0x20   : > { %475 = vmatprep.subr.bf16.mxu0 %v507_v1 }
  0x23   : > { %476 = vmatpush3.bf16.msra.mxu0 %v498_v21 }
  0x26   : > { %478 = vmatmul.mubr.bf16.vlgmr.msra.gmra.mrb[0].mxu0 %v255_v22 }
  0xf9   : > { %v361_v24 = vpop.f32.mrb[0].mxu0 }
  0xfa   : > { %v362_v25 = vadd.f32 %v437_v23, %v361_v24  ;;  %v479_v26 = vpop.f32.mrb[1].mxu0 }
  0xfb   : > { %v364_v27 = vpop.f32.mrb[2].mxu0 }
  0xfc   : > { %368 = vst [vmem:[%s226_s27] sm:$0xff] %v362_v25  ;;  %v365_v28 = vadd.f32 %v437_v23, %v364_v27  ;;  %v480_v29 = vpop.f32.mrb[3].mxu0 }
  0xfe   : > { %369 = vst [vmem:[%s226_s27 + $0x8] sm:$0xff] %v365_v28 }
  0xff PF: > { %s15_s18 = sadd.s32 1, %s505_s18  }
 0x100   : > { %p12_p4 = scmp.ge.s32.totalorder %s15_s18, 4  }
 0x102   :  { %14 = sbr.rel (!%p12_p4) target bundleno = 1 (0x1), region = 70 }

</bundles_post_ra>
